<compile_context>
chip_gen: v7x
topology: tpu7x:2x2x1
jax: 0.10.0
libtpu: 0.0.40
codegen_flags: <defaults>
</compile_context>

<pallas_src>
import jax
import jax.numpy as jnp
from jax.experimental import pallas as pl
from jax.experimental.pallas import tpu as pltpu

K_IN = 28 * 28                      # 784 (multiple of 16 -> bf16 sublane friendly)
H1, H2 = 512, 256
N_OUT, N_PAD = 10, 128
NEG_PAD = -1e30                     # drives padded logits to -inf-ish (f32 bias only)


def mlp_kernel(x_ref, w1_ref, c1_ref, w2_ref, c2_ref, w3_ref, c3_ref, o_ref):
    # fc1 (+ folded BN1) + relu.  x is already bf16; MXU accumulates in f32.
    h1 = jnp.dot(x_ref[...], w1_ref[...],
                 preferred_element_type=jnp.float32) + c1_ref[...]
    h1 = jnp.maximum(h1, 0.0)
    # dropout (eval mode): identity

    # fc2 (+ folded BN2) + relu
    h2 = jnp.dot(h1.astype(jnp.bfloat16), w2_ref[...],
                 preferred_element_type=jnp.float32) + c2_ref[...]
    h2 = jnp.maximum(h2, 0.0)
    # dropout (eval mode): identity

    # fc3 (padded to 128 lanes) + log_softmax over the padded row.
    # c3 stays float32: padded columns carry -1e30 -> exp underflows to 0,
    # leaving the LSE over the 10 real logits unchanged.
    logits = jnp.dot(h2.astype(jnp.bfloat16), w3_ref[...],
                     preferred_element_type=jnp.float32) + c3_ref[...]
    m = jnp.max(logits, axis=-1, keepdims=True)
    z = logits - m
    lse = jnp.log(jnp.sum(jnp.exp(z), axis=-1, keepdims=True))
    o_ref[...] = (z - lse).astype(o_ref.dtype)


def _pick_tb(B):
    """Batch tile: large enough to amortize per-step overhead, bounded padding
    waste, and >= 2 grid steps when possible so both v7x TCs get batch tiles."""
    if B <= 32:
        return ((B + 15) // 16) * 16            # single tile, 16-row aligned (bf16)
    for tb in (512, 384, 256, 128, 64, 32):     # largest acceptable wins
        bp = ((B + tb - 1) // tb) * tb
        if bp // tb < 2:
            continue                            # keep both v7x TensorCores busy
        if (bp - B) / bp > 0.25:
            continue                            # bound wasted MXU work / x DMA
        return tb
    return ((B + 15) // 16) * 16                # rare small-B fallback: single tile


def net_forward(x, params):
    """x: (B, 1, 28, 28) float32. Returns (B, 10) log-probabilities."""
    B = x.shape[0]
    # bf16 x stream (cast fuses with the reshape producer).  K stays 784.
    x2d = x.reshape(B, K_IN).astype(jnp.bfloat16)

    (w1t, b1, g1, be1, m1, v1,
     w2t, b2, g2, be2, m2, v2,
     w3t, b3) = params

    eps = 1e-5
    # Fold eval-mode BN into the preceding Linear:  (xW + b) bn-> xW' + c
    s1 = g1 / jnp.sqrt(v1 + eps)
    s2 = g2 / jnp.sqrt(v2 + eps)
    w1f = w1t * s1[None, :]
    c1 = (b1 - m1) * s1 + be1
    w2f = w2t * s2[None, :]
    c2 = (b2 - m2) * s2 + be2

    # Pad fc3 to 128 lane-dense output columns (bias pad = -1e30, f32).
    w3p = jnp.pad(w3t, ((0, 0), (0, N_PAD - N_OUT)))
    c3 = jnp.pad(b3, (0, N_PAD - N_OUT), constant_values=NEG_PAD)

    TB = _pick_tb(B)
    Bp = pl.cdiv(B, TB) * TB
    if Bp != B:
        x2d = jnp.pad(x2d, ((0, Bp - B), (0, 0)))   # zero rows -> finite log-probs, sliced off

    # Weights streamed as bf16 (halves weight HBM bytes; bf16 MXU path).
    w1b = w1f.astype(jnp.bfloat16)
    w2b = w2f.astype(jnp.bfloat16)
    w3b = w3p.astype(jnp.bfloat16)
    c1 = c1.reshape(1, H1).astype(jnp.float32)
    c2 = c2.reshape(1, H2).astype(jnp.float32)
    c3 = c3.reshape(1, N_PAD).astype(jnp.float32)   # MUST stay f32 (see header)

    grid = (Bp // TB,)

    cost = pl.CostEstimate(
        flops=2 * Bp * (K_IN * H1 + H1 * H2 + H2 * N_PAD),
        transcendentals=Bp * (N_PAD + 1),                         # exp + log per row
        bytes_accessed=(2 * (w1b.size + w2b.size + w3b.size)      # bf16 weights
                        + 4 * (c1.size + c2.size + c3.size)       # f32 biases
                        + 2 * Bp * K_IN                           # bf16 x in
                        + 4 * Bp * N_PAD),                        # f32 out
    )

    out = pl.pallas_call(
        mlp_kernel,
        out_shape=jax.ShapeDtypeStruct((Bp, N_PAD), jnp.float32),
        grid=grid,
        in_specs=[
            # x tile: streamed over batch (bf16, no K padding)
            pl.BlockSpec((TB, K_IN), lambda i: (i, 0)),
            # weights/biases: VMEM-resident, fetched once -> single buffer
            pl.BlockSpec((K_IN, H1), lambda i: (0, 0), pipeline_mode=pl.Buffered(1)),
            pl.BlockSpec((1, H1), lambda i: (0, 0), pipeline_mode=pl.Buffered(1)),
            pl.BlockSpec((H1, H2), lambda i: (0, 0), pipeline_mode=pl.Buffered(1)),
            pl.BlockSpec((1, H2), lambda i: (0, 0), pipeline_mode=pl.Buffered(1)),
            pl.BlockSpec((H2, N_PAD), lambda i: (0, 0), pipeline_mode=pl.Buffered(1)),
            pl.BlockSpec((1, N_PAD), lambda i: (0, 0), pipeline_mode=pl.Buffered(1)),
        ],
        out_specs=pl.BlockSpec((TB, N_PAD), lambda i: (i, 0)),
        compiler_params=pltpu.CompilerParams(
            dimension_semantics=("parallel",),        # shard batch tiles over TCs (v7x)
            vmem_limit_bytes=32 * 1024 * 1024,
        ),
        cost_estimate=cost,
    )(x2d, w1b, c1, w2b, c2, w3b, c3)

    # Drop batch padding and the 118 padded logit columns (plain-JAX glue).
    return out[:B, :N_OUT]


def init_params(key):
    """Deterministic parameter init matching nn.Linear / nn.BatchNorm1d shapes."""
    ks = jax.random.split(key, 6)

    def linear(kw, kb, fan_in, fan_out):
        bound = 1.0 / jnp.sqrt(fan_in)
        w = jax.random.uniform(kw, (fan_out, fan_in), jnp.float32, -bound, bound)
        b = jax.random.uniform(kb, (fan_out,), jnp.float32, -bound, bound)
        return w.T, b  # store transposed (in, out) for x @ W

    w1t, b1 = linear(ks[0], ks[1], K_IN, H1)
    w2t, b2 = linear(ks[2], ks[3], H1, H2)
    w3t, b3 = linear(ks[4], ks[5], H2, N_OUT)

    # BatchNorm1d defaults: weight=1, bias=0, running_mean=0, running_var=1
    g1, be1 = jnp.ones((H1,), jnp.float32), jnp.zeros((H1,), jnp.float32)
    m1, v1 = jnp.zeros((H1,), jnp.float32), jnp.ones((H1,), jnp.float32)
    g2, be2 = jnp.ones((H2,), jnp.float32), jnp.zeros((H2,), jnp.float32)
    m2, v2 = jnp.zeros((H2,), jnp.float32), jnp.ones((H2,), jnp.float32)

    return (w1t, b1, g1, be1, m1, v1,
            w2t, b2, g2, be2, m2, v2,
            w3t, b3)


def net_forward_ref(x, params):
    """Pure-JAX f32 reference (eval mode) for correctness checking."""
    B = x.shape[0]
    x2d = x.reshape(B, K_IN).astype(jnp.float32)
    (w1t, b1, g1, be1, m1, v1,
     w2t, b2, g2, be2, m2, v2,
     w3t, b3) = params
    eps = 1e-5
    h1 = x2d @ w1t + b1
    h1 = (h1 - m1) / jnp.sqrt(v1 + eps) * g1 + be1
    h1 = jnp.maximum(h1, 0.0)
    h2 = h1 @ w2t + b2
    h2 = (h2 - m2) / jnp.sqrt(v2 + eps) * g2 + be2
    h2 = jnp.maximum(h2, 0.0)
    logits = h2 @ w3t + b3
    return jax.nn.log_softmax(logits, axis=-1)


if __name__ == "__main__":
    key = jax.random.PRNGKey(0)
    k_param, k_x = jax.random.split(key)

    params = init_params(k_param)
    x = jax.random.normal(k_x, (8, 1, 28, 28), dtype=jnp.float32)

    out = jax.jit(lambda x: net_forward(x, params))(x)
    jax.block_until_ready(out)

    assert out.shape == (8, N_OUT)
    # log_softmax rows should (approximately) exp-sum to 1
    assert jnp.allclose(jnp.sum(jnp.exp(out), axis=1), 1.0, atol=1e-4)
    # match the f32 reference (bf16 x + bf16 weight streaming -> loose tolerance)
    ref = net_forward_ref(x, params)
    assert jnp.allclose(out, ref, atol=0.1), float(jnp.max(jnp.abs(out - ref)))
    print("KERNEL_OK")
</pallas_src>

<mosaic_0001>
module attributes {stable_mosaic.version = 11 : i64} {
  func.func @mlp_kernel(%arg0: i32, %arg1: memref<16x784xbf16, #tpu.memory_space<vmem>>, %arg2: memref<784x512xbf16, #tpu.memory_space<vmem>>, %arg3: memref<1x512xf32, #tpu.memory_space<vmem>>, %arg4: memref<512x256xbf16, #tpu.memory_space<vmem>>, %arg5: memref<1x256xf32, #tpu.memory_space<vmem>>, %arg6: memref<256x128xbf16, #tpu.memory_space<vmem>>, %arg7: memref<1x128xf32, #tpu.memory_space<vmem>>, %arg8: memref<16x128xf32, #tpu.memory_space<vmem>>) attributes {dimension_semantics = [#tpu.dimension_semantics<parallel>], iteration_bounds = array<i64: 1>, scalar_prefetch = 0 : i64, scratch_operands = 0 : i64, tpu.core_type = #tpu.core_type<tc>, window_params = [{transform_indices = @transform_0, window_bounds = array<i64: 16, 784>}, {pipeline_mode = #tpu.pipeline_mode<synchronous>, transform_indices = @transform_1, window_bounds = array<i64: 784, 512>}, {pipeline_mode = #tpu.pipeline_mode<synchronous>, transform_indices = @transform_2, window_bounds = array<i64: 1, 512>}, {pipeline_mode = #tpu.pipeline_mode<synchronous>, transform_indices = @transform_3, window_bounds = array<i64: 512, 256>}, {pipeline_mode = #tpu.pipeline_mode<synchronous>, transform_indices = @transform_4, window_bounds = array<i64: 1, 256>}, {pipeline_mode = #tpu.pipeline_mode<synchronous>, transform_indices = @transform_5, window_bounds = array<i64: 256, 128>}, {pipeline_mode = #tpu.pipeline_mode<synchronous>, transform_indices = @transform_6, window_bounds = array<i64: 1, 128>}, {transform_indices = @transform_7, window_bounds = array<i64: 16, 128>}]} {
    %c0 = arith.constant 0 : index
    %c0_0 = arith.constant 0 : index
    %0 = vector.load %arg1[%c0, %c0_0] : memref<16x784xbf16, #tpu.memory_space<vmem>>, vector<16x784xbf16>
    %c0_1 = arith.constant 0 : index
    %c0_2 = arith.constant 0 : index
    %1 = vector.load %arg2[%c0_1, %c0_2] : memref<784x512xbf16, #tpu.memory_space<vmem>>, vector<784x512xbf16>
    %cst = arith.constant dense<0.000000e+00> : vector<16x512xf32>
    %2 = tpu.matmul %0, %1, %cst {dimension_numbers = #tpu.dot_dimension_numbers<[1], [0], [0], [1], [0, 0, 1, 1], [], []>} : vector<16x784xbf16>, vector<784x512xbf16>, vector<16x512xf32> -> vector<16x512xf32>
    %c0_3 = arith.constant 0 : index
    %c0_4 = arith.constant 0 : index
    %3 = vector.load %arg3[%c0_3, %c0_4] : memref<1x512xf32, #tpu.memory_space<vmem>>, vector<1x512xf32>
    %4 = vector.broadcast %3 : vector<1x512xf32> to vector<16x512xf32>
    %5 = arith.addf %2, %4 : vector<16x512xf32>
    %cst_5 = arith.constant 0.000000e+00 : f32
    %6 = vector.broadcast %cst_5 : f32 to vector<16x512xf32>
    %7 = arith.maximumf %5, %6 : vector<16x512xf32>
    %8 = arith.truncf %7 : vector<16x512xf32> to vector<16x512xbf16>
    %c0_6 = arith.constant 0 : index
    %c0_7 = arith.constant 0 : index
    %9 = vector.load %arg4[%c0_6, %c0_7] : memref<512x256xbf16, #tpu.memory_space<vmem>>, vector<512x256xbf16>
    %cst_8 = arith.constant dense<0.000000e+00> : vector<16x256xf32>
    %10 = tpu.matmul %8, %9, %cst_8 {dimension_numbers = #tpu.dot_dimension_numbers<[1], [0], [0], [1], [0, 0, 1, 1], [], []>} : vector<16x512xbf16>, vector<512x256xbf16>, vector<16x256xf32> -> vector<16x256xf32>
    %c0_9 = arith.constant 0 : index
    %c0_10 = arith.constant 0 : index
    %11 = vector.load %arg5[%c0_9, %c0_10] : memref<1x256xf32, #tpu.memory_space<vmem>>, vector<1x256xf32>
    %12 = vector.broadcast %11 : vector<1x256xf32> to vector<16x256xf32>
    %13 = arith.addf %10, %12 : vector<16x256xf32>
    %cst_11 = arith.constant 0.000000e+00 : f32
    %14 = vector.broadcast %cst_11 : f32 to vector<16x256xf32>
    %15 = arith.maximumf %13, %14 : vector<16x256xf32>
    %16 = arith.truncf %15 : vector<16x256xf32> to vector<16x256xbf16>
    %c0_12 = arith.constant 0 : index
    %c0_13 = arith.constant 0 : index
    %17 = vector.load %arg6[%c0_12, %c0_13] : memref<256x128xbf16, #tpu.memory_space<vmem>>, vector<256x128xbf16>
    %cst_14 = arith.constant dense<0.000000e+00> : vector<16x128xf32>
    %18 = tpu.matmul %16, %17, %cst_14 {dimension_numbers = #tpu.dot_dimension_numbers<[1], [0], [0], [1], [0, 0, 1, 1], [], []>} : vector<16x256xbf16>, vector<256x128xbf16>, vector<16x128xf32> -> vector<16x128xf32>
    %c0_15 = arith.constant 0 : index
    %c0_16 = arith.constant 0 : index
    %19 = vector.load %arg7[%c0_15, %c0_16] : memref<1x128xf32, #tpu.memory_space<vmem>>, vector<1x128xf32>
    %20 = vector.broadcast %19 : vector<1x128xf32> to vector<16x128xf32>
    %21 = arith.addf %18, %20 : vector<16x128xf32>
    %cst_17 = arith.constant dense<0xFF800000> : vector<16xf32>
    %22 = vector.multi_reduction <maximumf>, %21, %cst_17 [1] : vector<16x128xf32> to vector<16xf32>
    %23 = vector.shape_cast %22 : vector<16xf32> to vector<16x1xf32>
    %24 = vector.broadcast %23 : vector<16x1xf32> to vector<16x128xf32>
    %25 = arith.subf %21, %24 : vector<16x128xf32>
    %26 = math.exp %25 : vector<16x128xf32>
    %cst_18 = arith.constant dense<0.000000e+00> : vector<16xf32>
    %27 = vector.multi_reduction <add>, %26, %cst_18 [1] : vector<16x128xf32> to vector<16xf32>
    %28 = vector.shape_cast %27 : vector<16xf32> to vector<16x1xf32>
    %29 = math.log %28 : vector<16x1xf32>
    %30 = vector.broadcast %29 : vector<16x1xf32> to vector<16x128xf32>
    %31 = arith.subf %25, %30 : vector<16x128xf32>
    %c0_19 = arith.constant 0 : index
    %c0_20 = arith.constant 0 : index
    %32 = vector.load %arg8[%c0_19, %c0_20] : memref<16x128xf32, #tpu.memory_space<vmem>>, vector<16x128xf32>
    tpu.vector_store %arg8[%c0_19, %c0_20], %31 {strides = array<i32>} : memref<16x128xf32, #tpu.memory_space<vmem>>, vector<16x128xf32>,
    return
  }
  func.func @transform_0(%arg0: i32) -> (i32, i32) {
    %c0_i32 = arith.constant 0 : i32
    %c0_i32_0 = arith.constant 0 : i32
    return %arg0, %c0_i32 : i32, i32
  }
  func.func @transform_1(%arg0: i32) -> (i32, i32) {
    %c0_i32 = arith.constant 0 : i32
    %c0_i32_0 = arith.constant 0 : i32
    %c0_i32_1 = arith.constant 0 : i32
    return %c0_i32, %c0_i32_0 : i32, i32
  }
  func.func @transform_2(%arg0: i32) -> (i32, i32) {
    %c0_i32 = arith.constant 0 : i32
    %c0_i32_0 = arith.constant 0 : i32
    %c0_i32_1 = arith.constant 0 : i32
    return %c0_i32, %c0_i32_0 : i32, i32
  }
  func.func @transform_3(%arg0: i32) -> (i32, i32) {
    %c0_i32 = arith.constant 0 : i32
    %c0_i32_0 = arith.constant 0 : i32
    %c0_i32_1 = arith.constant 0 : i32
    return %c0_i32, %c0_i32_0 : i32, i32
  }
  func.func @transform_4(%arg0: i32) -> (i32, i32) {
    %c0_i32 = arith.constant 0 : i32
    %c0_i32_0 = arith.constant 0 : i32
    %c0_i32_1 = arith.constant 0 : i32
    return %c0_i32, %c0_i32_0 : i32, i32
  }
  func.func @transform_5(%arg0: i32) -> (i32, i32) {
    %c0_i32 = arith.constant 0 : i32
    %c0_i32_0 = arith.constant 0 : i32
    %c0_i32_1 = arith.constant 0 : i32
    return %c0_i32, %c0_i32_0 : i32, i32
  }
  func.func @transform_6(%arg0: i32) -> (i32, i32) {
    %c0_i32 = arith.constant 0 : i32
    %c0_i32_0 = arith.constant 0 : i32
    %c0_i32_1 = arith.constant 0 : i32
    return %c0_i32, %c0_i32_0 : i32, i32
  }
  func.func @transform_7(%arg0: i32) -> (i32, i32) {
    %c0_i32 = arith.constant 0 : i32
    %c0_i32_0 = arith.constant 0 : i32
    return %arg0, %c0_i32 : i32, i32
  }
}

</mosaic_0001>

<bundles_post_ra>
// kernel: _lambda_.1
= control target key start
LH: loop header
LB: loop body
LE: loop exit
PB: predicated region body
PF: predicated region fallthrough
CT: control target
= control target key end

     0   :  { %vm1268_vm0 = vcmask 130048   ;;  %s4050_s1 = inlined_call_operand.vmem [shape: bf16[784,512], index: 1, kind: input, shape index: {}]   ;;  %s4051_s0 = inlined_call_operand.vmem [shape: bf16[16,784], index: 0, kind: input, shape index: {}]   ;;  %s4052_s3 = inlined_call_operand.vmem [shape: bf16[512,256], index: 3, kind: input, shape index: {}]   ;;  %s4053_s2 = inlined_call_operand.vmem [shape: f32[1,512], index: 2, kind: input, shape index: {}]   ;;  %s4054_s5 = inlined_call_operand.vmem [shape: bf16[256,128], index: 5, kind: input, shape index: {}]   ;;  %s4055_s4 = inlined_call_operand.vmem [shape: f32[1,256], index: 4, kind: input, shape index: {}]   ;;  %s4056_s6 = inlined_call_operand.vmem [shape: f32[1,128], index: 6, kind: input, shape index: {}]   ;;  %s4057_s7 = inlined_call_operand.vmem [shape: f32[16,128], index: 7, kind: output, shape index: {}]  }
   0x1   :  { %v2667_v0 = vld [vmem:[%s4050_s1 + $0x4] ss:$16 sps:$4 sm:$0xff]   ;;  %v2671_v2 = vld [vmem:[%s4050_s1] ss:$16 sps:$4 sm:$0xff]   ;;  %v3288_v51 = vld [vmem:[%s4051_s0 + $0xc] ss:$28 sps:$4 sm:$0xff]  }
   0x2   :  { %v2669_v1 = vld [vmem:[%s4050_s1 + $0x204] ss:$16 sps:$4 sm:$0xff]   ;;  %1272 = vmatprep.subr.bf16.mxu1 %v2667_v0  ;;  %v2672_v3 = vld [vmem:[%s4050_s1 + $0x200] ss:$16 sps:$4 sm:$0xff]   ;;  %1347 = vmatprep.mubr.bf16.mxu0 %v3288_v51 }
   0x3   :  { %1315 = vmatprep.subr.bf16.mxu0 %v2669_v1  ;;  %v2673_v4 = vld [vmem:[%s4050_s1 + $0x24] ss:$16 sps:$4 sm:$0xff]   ;;  %1273 = vmatpush1.bf16.msra.mxu1 %v2671_v2  ;;  %v2677_v6 = vld [vmem:[%s4050_s1 + $0x20] ss:$16 sps:$4 sm:$0xff]  }
   0x4   :  { %1316 = vmatpush1.bf16.msra.mxu0 %v2672_v3  ;;  %v2675_v5 = vld [vmem:[%s4050_s1 + $0x224] ss:$16 sps:$4 sm:$0xff]   ;;  %1274 = vmatprep.subr.bf16.mxu1 %v2673_v4  ;;  %v2678_v7 = vld [vmem:[%s4050_s1 + $0x220] ss:$16 sps:$4 sm:$0xff]   ;;  %v2774_v3 = vld [vmem:[%s4050_s1 + $0xc] ss:$16 sps:$4 sm:$0xff]  }
   0x5   :  { %1317 = vmatprep.subr.bf16.mxu0 %v2675_v5  ;;  %v2679_v8 = vld [vmem:[%s4050_s1 + $0x44] ss:$16 sps:$4 sm:$0xff]   ;;  %v2683_v10 = vld [vmem:[%s4050_s1 + $0x40] ss:$16 sps:$4 sm:$0xff]  }
   0x6   :  { %v2681_v9 = vld [vmem:[%s4050_s1 + $0x244] ss:$16 sps:$4 sm:$0xff]   ;;  %v2684_v11 = vld [vmem:[%s4050_s1 + $0x240] ss:$16 sps:$4 sm:$0xff]  }
   0x7   :  { %1275 = vmatpush1.bf16.msra.mxu1 %v2677_v6  ;;  %v2685_v12 = vld [vmem:[%s4050_s1 + $0x64] ss:$16 sps:$4 sm:$0xff]   ;;  %v2689_v14 = vld [vmem:[%s4050_s1 + $0x60] ss:$16 sps:$4 sm:$0xff]  }
   0x8   :  { %1318 = vmatpush1.bf16.msra.mxu0 %v2678_v7  ;;  %1276 = vmatprep.subr.bf16.mxu1 %v2679_v8  ;;  %v2687_v13 = vld [vmem:[%s4050_s1 + $0x264] ss:$16 sps:$4 sm:$0xff]   ;;  %v2690_v15 = vld [vmem:[%s4050_s1 + $0x260] ss:$16 sps:$4 sm:$0xff]   ;;  %v2772_v7 = vld [vmem:[%s4050_s1 + $0x8] ss:$16 sps:$4 sm:$0xff]  }
   0x9   :  { %1319 = vmatprep.subr.bf16.mxu0 %v2681_v9  ;;  %v2691_v16 = vld [vmem:[%s4050_s1 + $0x84] ss:$16 sps:$4 sm:$0xff]   ;;  %v2695_v18 = vld [vmem:[%s4050_s1 + $0x80] ss:$16 sps:$4 sm:$0xff]   ;;  %v2780_v9 = vld [vmem:[%s4050_s1 + $0x2c] ss:$16 sps:$4 sm:$0xff]  }
   0xa   :  { %v2693_v17 = vld [vmem:[%s4050_s1 + $0x284] ss:$16 sps:$4 sm:$0xff]   ;;  %v2696_v19 = vld [vmem:[%s4050_s1 + $0x280] ss:$16 sps:$4 sm:$0xff]  }
   0xb   :  { %1277 = vmatpush1.bf16.msra.mxu1 %v2683_v10  ;;  %v2697_v20 = vld [vmem:[%s4050_s1 + $0xa4] ss:$16 sps:$4 sm:$0xff]   ;;  %v2701_v22 = vld [vmem:[%s4050_s1 + $0xa0] ss:$16 sps:$4 sm:$0xff]  }
   0xc   :  { %1320 = vmatpush1.bf16.msra.mxu0 %v2684_v11  ;;  %1278 = vmatprep.subr.bf16.mxu1 %v2685_v12  ;;  %v2699_v21 = vld [vmem:[%s4050_s1 + $0x2a4] ss:$16 sps:$4 sm:$0xff]   ;;  %v2702_v23 = vld [vmem:[%s4050_s1 + $0x2a0] ss:$16 sps:$4 sm:$0xff]   ;;  %v2778_v11 = vld [vmem:[%s4050_s1 + $0x28] ss:$16 sps:$4 sm:$0xff]  }
   0xd   :  { %1321 = vmatprep.subr.bf16.mxu0 %v2687_v13  ;;  %v2703_v24 = vld [vmem:[%s4050_s1 + $0xc4] ss:$16 sps:$4 sm:$0xff]   ;;  %v2707_v26 = vld [vmem:[%s4050_s1 + $0xc0] ss:$16 sps:$4 sm:$0xff]   ;;  %v2786_v13 = vld [vmem:[%s4050_s1 + $0x4c] ss:$16 sps:$4 sm:$0xff]  }
   0xe   :  { %v2705_v25 = vld [vmem:[%s4050_s1 + $0x2c4] ss:$16 sps:$4 sm:$0xff]   ;;  %v2708_v27 = vld [vmem:[%s4050_s1 + $0x2c0] ss:$16 sps:$4 sm:$0xff]  }
   0xf   :  { %1279 = vmatpush1.bf16.msra.mxu1 %v2689_v14  ;;  %v2709_v28 = vld [vmem:[%s4050_s1 + $0xe4] ss:$16 sps:$4 sm:$0xff]   ;;  %v2713_v30 = vld [vmem:[%s4050_s1 + $0xe0] ss:$16 sps:$4 sm:$0xff]  }
  0x10   :  { %1322 = vmatpush1.bf16.msra.mxu0 %v2690_v15  ;;  %1280 = vmatprep.subr.bf16.mxu1 %v2691_v16  ;;  %v2711_v29 = vld [vmem:[%s4050_s1 + $0x2e4] ss:$16 sps:$4 sm:$0xff]   ;;  %v2714_v31 = vld [vmem:[%s4050_s1 + $0x2e0] ss:$16 sps:$4 sm:$0xff]   ;;  %v2784_v15 = vld [vmem:[%s4050_s1 + $0x48] ss:$16 sps:$4 sm:$0xff]  }
  0x11   :  { %1323 = vmatprep.subr.bf16.mxu0 %v2693_v17  ;;  %v2715_v32 = vld [vmem:[%s4050_s1 + $0x104] ss:$16 sps:$4 sm:$0xff]   ;;  %v2719_v34 = vld [vmem:[%s4050_s1 + $0x100] ss:$16 sps:$4 sm:$0xff]   ;;  %v2792_v17 = vld [vmem:[%s4050_s1 + $0x6c] ss:$16 sps:$4 sm:$0xff]  }
  0x12   :  { %v2717_v33 = vld [vmem:[%s4050_s1 + $0x304] ss:$16 sps:$4 sm:$0xff]   ;;  %v2720_v35 = vld [vmem:[%s4050_s1 + $0x300] ss:$16 sps:$4 sm:$0xff]  }
  0x13   :  { %1281 = vmatpush1.bf16.msra.mxu1 %v2695_v18  ;;  %v2721_v36 = vld [vmem:[%s4050_s1 + $0x124] ss:$16 sps:$4 sm:$0xff]   ;;  %v2725_v38 = vld [vmem:[%s4050_s1 + $0x120] ss:$16 sps:$4 sm:$0xff]  }
  0x14   :  { %1324 = vmatpush1.bf16.msra.mxu0 %v2696_v19  ;;  %1282 = vmatprep.subr.bf16.mxu1 %v2697_v20  ;;  %v2723_v37 = vld [vmem:[%s4050_s1 + $0x324] ss:$16 sps:$4 sm:$0xff]   ;;  %v2726_v39 = vld [vmem:[%s4050_s1 + $0x320] ss:$16 sps:$4 sm:$0xff]   ;;  %v2790_v19 = vld [vmem:[%s4050_s1 + $0x68] ss:$16 sps:$4 sm:$0xff]  }
  0x15   :  { %1325 = vmatprep.subr.bf16.mxu0 %v2699_v21  ;;  %v2727_v40 = vld [vmem:[%s4050_s1 + $0x144] ss:$16 sps:$4 sm:$0xff]   ;;  %v2731_v42 = vld [vmem:[%s4050_s1 + $0x140] ss:$16 sps:$4 sm:$0xff]   ;;  %v2798_v21 = vld [vmem:[%s4050_s1 + $0x8c] ss:$16 sps:$4 sm:$0xff]  }
  0x16   :  { %v2729_v41 = vld [vmem:[%s4050_s1 + $0x344] ss:$16 sps:$4 sm:$0xff]   ;;  %v2732_v43 = vld [vmem:[%s4050_s1 + $0x340] ss:$16 sps:$4 sm:$0xff]  }
  0x17   :  { %1283 = vmatpush1.bf16.msra.mxu1 %v2701_v22  ;;  %v2733_v44 = vld [vmem:[%s4050_s1 + $0x164] ss:$16 sps:$4 sm:$0xff]   ;;  %v2737_v46 = vld [vmem:[%s4050_s1 + $0x160] ss:$16 sps:$4 sm:$0xff]  }
  0x18   :  { %1326 = vmatpush1.bf16.msra.mxu0 %v2702_v23  ;;  %1284 = vmatprep.subr.bf16.mxu1 %v2703_v24  ;;  %v2735_v45 = vld [vmem:[%s4050_s1 + $0x364] ss:$16 sps:$4 sm:$0xff]   ;;  %v2738_v47 = vld [vmem:[%s4050_s1 + $0x360] ss:$16 sps:$4 sm:$0xff]   ;;  %v2796_v23 = vld [vmem:[%s4050_s1 + $0x88] ss:$16 sps:$4 sm:$0xff]  }
  0x19   :  { %1327 = vmatprep.subr.bf16.mxu0 %v2705_v25  ;;  %v2739_v48 = vld [vmem:[%s4050_s1 + $0x184] ss:$16 sps:$4 sm:$0xff]   ;;  %v2743_v52 = vld [vmem:[%s4050_s1 + $0x180] ss:$16 sps:$4 sm:$0xff]   ;;  %v2804_v25 = vld [vmem:[%s4050_s1 + $0xac] ss:$16 sps:$4 sm:$0xff]  }
  0x1a   :  { %v2765_v49 = vld [vmem:[%s4051_s0 + $0x4] ss:$28 sps:$4 sm:$0xff]  }
  0x1b   :  { %1285 = vmatpush1.bf16.msra.mxu1 %v2707_v26  ;;  %v2741_v50 = vld [vmem:[%s4050_s1 + $0x384] ss:$16 sps:$4 sm:$0xff]   ;;  %1304 = vmatprep.mubr.bf16.mxu1 %v2765_v49  ;;  %v2744_v53 = vld [vmem:[%s4050_s1 + $0x380] ss:$16 sps:$4 sm:$0xff]  }
  0x1c   :  { %1328 = vmatpush1.bf16.msra.mxu0 %v2708_v27  ;;  %1286 = vmatprep.subr.bf16.mxu1 %v2709_v28  ;;  %v2745_v54 = vld [vmem:[%s4050_s1 + $0x1a4] ss:$16 sps:$4 sm:$0xff]   ;;  %v2749_v56 = vld [vmem:[%s4050_s1 + $0x1a0] ss:$16 sps:$4 sm:$0xff]   ;;  %v2802_v27 = vld [vmem:[%s4050_s1 + $0xa8] ss:$16 sps:$4 sm:$0xff]  }
  0x1d   :  { %1329 = vmatprep.subr.bf16.mxu0 %v2711_v29  ;;  %v2747_v55 = vld [vmem:[%s4050_s1 + $0x3a4] ss:$16 sps:$4 sm:$0xff]   ;;  %v2750_v57 = vld [vmem:[%s4050_s1 + $0x3a0] ss:$16 sps:$4 sm:$0xff]   ;;  %v2810_v29 = vld [vmem:[%s4050_s1 + $0xcc] ss:$16 sps:$4 sm:$0xff]  }
  0x1e   :  { %v2751_v58 = vld [vmem:[%s4050_s1 + $0x1c4] ss:$16 sps:$4 sm:$0xff]   ;;  %v2755_v60 = vld [vmem:[%s4050_s1 + $0x1c0] ss:$16 sps:$4 sm:$0xff]  }
  0x1f   :  { %1287 = vmatpush1.bf16.msra.mxu1 %v2713_v30  ;;  %v2753_v59 = vld [vmem:[%s4050_s1 + $0x3c4] ss:$16 sps:$4 sm:$0xff]   ;;  %v2756_v61 = vld [vmem:[%s4050_s1 + $0x3c0] ss:$16 sps:$4 sm:$0xff]  }
  0x20   :  { %1330 = vmatpush1.bf16.msra.mxu0 %v2714_v31  ;;  %1288 = vmatprep.subr.bf16.mxu1 %v2715_v32  ;;  %v2757_v62 = vld [vmem:[%s4050_s1 + $0x1e4] ss:$16 sps:$4 sm:$0xff]   ;;  %v2761_v0 = vld [vmem:[%s4050_s1 + $0x1e0] ss:$16 sps:$4 sm:$0xff]   ;;  %v2808_v31 = vld [vmem:[%s4050_s1 + $0xc8] ss:$16 sps:$4 sm:$0xff]  }
  0x21   :  { %1331 = vmatprep.subr.bf16.mxu0 %v2717_v33  ;;  %v2759_v63 = vld [vmem:[%s4050_s1 + $0x3e4] ss:$16 sps:$4 sm:$0xff]   ;;  %v2762_v1 = vld [vmem:[%s4050_s1 + $0x3e0] ss:$16 sps:$4 sm:$0xff]   ;;  %v2816_v33 = vld [vmem:[%s4050_s1 + $0xec] ss:$16 sps:$4 sm:$0xff]  }
  0x22   :  { %v2771_v2 = vld [vmem:[%s4050_s1 + $0x404] ss:$16 sps:$4 sm:$0xff]   ;;  %v3342_v4 = vld [vmem:[%s4051_s0] ss:$28 sps:$4 sm:$0xff]  }
  0x23   :  { %1289 = vmatpush1.bf16.msra.mxu1 %v2719_v34  ;;  %v3347_v5 = vld [vmem:[%s4051_s0 + $0x8] ss:$28 sps:$4 sm:$0xff]   ;;  %v2769_v6 = vld [vmem:[%s4050_s1 + $0x400] ss:$16 sps:$4 sm:$0xff]  }
  0x24   :  { %1332 = vmatpush1.bf16.msra.mxu0 %v2720_v35  ;;  %1290 = vmatprep.subr.bf16.mxu1 %v2721_v36  ;;  %v2777_v8 = vld [vmem:[%s4050_s1 + $0x424] ss:$16 sps:$4 sm:$0xff]   ;;  %v2775_v10 = vld [vmem:[%s4050_s1 + $0x420] ss:$16 sps:$4 sm:$0xff]   ;;  %v2814_v36 = vld [vmem:[%s4050_s1 + $0xe8] ss:$16 sps:$4 sm:$0xff]  }
  0x25   :  { %1333 = vmatprep.subr.bf16.mxu0 %v2723_v37  ;;  %v2783_v12 = vld [vmem:[%s4050_s1 + $0x444] ss:$16 sps:$4 sm:$0xff]   ;;  %v2781_v14 = vld [vmem:[%s4050_s1 + $0x440] ss:$16 sps:$4 sm:$0xff]  }
  0x26   :  { %v2789_v16 = vld [vmem:[%s4050_s1 + $0x464] ss:$16 sps:$4 sm:$0xff]   ;;  %v2787_v18 = vld [vmem:[%s4050_s1 + $0x460] ss:$16 sps:$4 sm:$0xff]  }
  0x27   :  { %1291 = vmatpush1.bf16.msra.mxu1 %v2725_v38  ;;  %v2795_v20 = vld [vmem:[%s4050_s1 + $0x484] ss:$16 sps:$4 sm:$0xff]   ;;  %v2793_v22 = vld [vmem:[%s4050_s1 + $0x480] ss:$16 sps:$4 sm:$0xff]   ;;  %v2822_v38 = vld [vmem:[%s4050_s1 + $0x10c] ss:$16 sps:$4 sm:$0xff]  }
  0x28   :  { %1334 = vmatpush1.bf16.msra.mxu0 %v2726_v39  ;;  %1292 = vmatprep.subr.bf16.mxu1 %v2727_v40  ;;  %v2801_v24 = vld [vmem:[%s4050_s1 + $0x4a4] ss:$16 sps:$4 sm:$0xff]   ;;  %v2799_v26 = vld [vmem:[%s4050_s1 + $0x4a0] ss:$16 sps:$4 sm:$0xff]   ;;  %v2820_v40 = vld [vmem:[%s4050_s1 + $0x108] ss:$16 sps:$4 sm:$0xff]  }
  0x29   :  { %1335 = vmatprep.subr.bf16.mxu0 %v2729_v41  ;;  %v2807_v28 = vld [vmem:[%s4050_s1 + $0x4c4] ss:$16 sps:$4 sm:$0xff]   ;;  %v2805_v30 = vld [vmem:[%s4050_s1 + $0x4c0] ss:$16 sps:$4 sm:$0xff]  }
  0x2a   :  { %v2813_v32 = vld [vmem:[%s4050_s1 + $0x4e4] ss:$16 sps:$4 sm:$0xff]   ;;  %v2811_v35 = vld [vmem:[%s4050_s1 + $0x4e0] ss:$16 sps:$4 sm:$0xff]  }
  0x2b   :  { %1293 = vmatpush1.bf16.msra.mxu1 %v2731_v42  ;;  %v3438_v34 = vld [vmem:[%s4051_s0 + $0x14] ss:$28 sps:$4 sm:$0xff]   ;;  %v2828_v42 = vld [vmem:[%s4050_s1 + $0x12c] ss:$16 sps:$4 sm:$0xff]  }
  0x2c   :  { %1336 = vmatpush1.bf16.msra.mxu0 %v2732_v43  ;;  %1294 = vmatprep.subr.bf16.mxu1 %v2733_v44  ;;  %v2819_v37 = vld [vmem:[%s4050_s1 + $0x504] ss:$16 sps:$4 sm:$0xff]   ;;  %v2817_v39 = vld [vmem:[%s4050_s1 + $0x500] ss:$16 sps:$4 sm:$0xff]   ;;  %v2826_v44 = vld [vmem:[%s4050_s1 + $0x128] ss:$16 sps:$4 sm:$0xff]  }
  0x2d   :  { %1337 = vmatprep.subr.bf16.mxu0 %v2735_v45  ;;  %v2825_v41 = vld [vmem:[%s4050_s1 + $0x524] ss:$16 sps:$4 sm:$0xff]   ;;  %v2823_v43 = vld [vmem:[%s4050_s1 + $0x520] ss:$16 sps:$4 sm:$0xff]  }
  0x2e   :  { %v2831_v45 = vld [vmem:[%s4050_s1 + $0x544] ss:$16 sps:$4 sm:$0xff]  }
  0x2f   :  { %1295 = vmatpush1.bf16.msra.mxu1 %v2737_v46  ;;  %v2834_v46 = vld [vmem:[%s4050_s1 + $0x14c] ss:$16 sps:$4 sm:$0xff]  }
  0x30   :  { %1338 = vmatpush1.bf16.msra.mxu0 %v2738_v47  ;;  %1296 = vmatprep.subr.bf16.mxu1 %v2739_v48  ;;  %v2829_v47 = vld [vmem:[%s4050_s1 + $0x540] ss:$16 sps:$4 sm:$0xff]   ;;  %v2832_v48 = vld [vmem:[%s4050_s1 + $0x148] ss:$16 sps:$4 sm:$0xff]  }
  0x31   :  { %1339 = vmatprep.subr.bf16.mxu0 %v2741_v50  ;;  %v2840_v50 = vld [vmem:[%s4050_s1 + $0x16c] ss:$16 sps:$4 sm:$0xff]  }
  0x33   :  { %1297 = vmatpush1.bf16.msra.mxu1 %v2743_v52  ;;  %v2835_v52 = vld [vmem:[%s4050_s1 + $0x560] ss:$16 sps:$4 sm:$0xff]  }
  0x34   :  { %1340 = vmatpush1.bf16.msra.mxu0 %v2744_v53  ;;  %1298 = vmatprep.subr.bf16.mxu1 %v2745_v54  ;;  %v2838_v53 = vld [vmem:[%s4050_s1 + $0x168] ss:$16 sps:$4 sm:$0xff]   ;;  %v2843_v54 = vld [vmem:[%s4050_s1 + $0x584] ss:$16 sps:$4 sm:$0xff]  }
  0x35   :  { %1341 = vmatprep.subr.bf16.mxu0 %v2747_v55  ;;  %v2846_v55 = vld [vmem:[%s4050_s1 + $0x18c] ss:$16 sps:$4 sm:$0xff]  }
  0x37   :  { %1299 = vmatpush1.bf16.msra.mxu1 %v2749_v56  ;;  %v2841_v56 = vld [vmem:[%s4050_s1 + $0x580] ss:$16 sps:$4 sm:$0xff]  }
  0x38   :  { %1342 = vmatpush1.bf16.msra.mxu0 %v2750_v57  ;;  %1300 = vmatprep.subr.bf16.mxu1 %v2751_v58  ;;  %v2844_v57 = vld [vmem:[%s4050_s1 + $0x188] ss:$16 sps:$4 sm:$0xff]   ;;  %v2849_v58 = vld [vmem:[%s4050_s1 + $0x5a4] ss:$16 sps:$4 sm:$0xff]  }
  0x39   :  { %1343 = vmatprep.subr.bf16.mxu0 %v2753_v59  ;;  %v2852_v59 = vld [vmem:[%s4050_s1 + $0x1ac] ss:$16 sps:$4 sm:$0xff]  }
  0x3b   :  { %1301 = vmatpush1.bf16.msra.mxu1 %v2755_v60  ;;  %v2847_v60 = vld [vmem:[%s4050_s1 + $0x5a0] ss:$16 sps:$4 sm:$0xff]  }
  0x3c   :  { %1344 = vmatpush1.bf16.msra.mxu0 %v2756_v61  ;;  %1302 = vmatprep.subr.bf16.mxu1 %v2757_v62  ;;  %v2850_v61 = vld [vmem:[%s4050_s1 + $0x1a8] ss:$16 sps:$4 sm:$0xff]   ;;  %v2855_v62 = vld [vmem:[%s4050_s1 + $0x5c4] ss:$16 sps:$4 sm:$0xff]  }
  0x3d   :  { %1345 = vmatprep.subr.bf16.mxu0 %v2759_v63  ;;  %v2858_v63 = vld [vmem:[%s4050_s1 + $0x1cc] ss:$16 sps:$4 sm:$0xff]  }
  0x3f   :  { %1303 = vmatpush1.bf16.msra.mxu1 %v2761_v0  ;;  %v2853_v0 = vld [vmem:[%s4050_s1 + $0x5c0] ss:$16 sps:$4 sm:$0xff]  }
  0x40   :  { %1346 = vmatpush1.bf16.msra.mxu0 %v2762_v1  ;;  %1444 = vmatprep.subr.bf16.mxu1 %v2774_v3  ;;  %v2856_v1 = vld [vmem:[%s4050_s1 + $0x1c8] ss:$16 sps:$4 sm:$0xff]   ;;  %v2864_v3 = vld [vmem:[%s4050_s1 + $0x1ec] ss:$16 sps:$4 sm:$0xff]  }
  0x41   :  { %1358 = vmatprep.subr.bf16.mxu0 %v2771_v2  ;;  %v2861_v2 = vld [vmem:[%s4050_s1 + $0x5e4] ss:$16 sps:$4 sm:$0xff]  }
  0x42   :  { %1305 = vmatmul.mubr.bf16.vlgmr.msra.gmra.mrb[0].mxu1 %v3342_v4 }
  0x43   :  { %1348 = vmatmul.mubr.bf16.vlgmr.msra.gmra.mrb[0].mxu0 %v3347_v5  ;;  %1445 = vmatpush1.bf16.msra.mxu1 %v2772_v7  ;;  %v2862_v7 = vld [vmem:[%s4050_s1 + $0x1e8] ss:$16 sps:$4 sm:$0xff]  }
  0x44   :  { %1359 = vmatpush1.bf16.msra.mxu0 %v2769_v6  ;;  %1446 = vmatprep.subr.bf16.mxu1 %v2780_v9  ;;  %v2859_v6 = vld [vmem:[%s4050_s1 + $0x5e0] ss:$16 sps:$4 sm:$0xff]   ;;  %v2876_v9 = vld [vmem:[%s4050_s1 + $0x604] ss:$16 sps:$4 sm:$0xff]  }
  0x45   :  { %1360 = vmatprep.subr.bf16.mxu0 %v2777_v8  ;;  %1476 = vmatprep.mubr.bf16.mxu1 %v2765_v49  ;;  %v2837_v49 = vld [vmem:[%s4050_s1 + $0x564] ss:$16 sps:$4 sm:$0xff]   ;;  %v2870_v8 = vld [vmem:[%s4050_s1 + $0x20c] ss:$16 sps:$4 sm:$0xff]  }
  0x46   :  { %1390 = vmatprep.mubr.bf16.mxu0 %v3438_v34 }
  0x47   :  { %1447 = vmatpush1.bf16.msra.mxu1 %v2778_v11  ;;  %v2868_v11 = vld [vmem:[%s4050_s1 + $0x208] ss:$16 sps:$4 sm:$0xff]  }
  0x48   :  { %1361 = vmatpush1.bf16.msra.mxu0 %v2775_v10  ;;  %1448 = vmatprep.subr.bf16.mxu1 %v2786_v13  ;;  %v3552_v10 = vld [vmem:[%s4051_s0 + $0x10] ss:$28 sps:$4 sm:$0xff]  }
  0x49   :  { %1362 = vmatprep.subr.bf16.mxu0 %v2783_v12  ;;  %v2874_v12 = vld [vmem:[%s4050_s1 + $0x600] ss:$16 sps:$4 sm:$0xff]   ;;  %v2873_v13 = vld [vmem:[%s4050_s1 + $0x22c] ss:$16 sps:$4 sm:$0xff]  }
  0x4b   :  { %1449 = vmatpush1.bf16.msra.mxu1 %v2784_v15  ;;  %v2879_v15 = vld [vmem:[%s4050_s1 + $0x24c] ss:$16 sps:$4 sm:$0xff]  }
  0x4c   :  { %1363 = vmatpush1.bf16.msra.mxu0 %v2781_v14  ;;  %1450 = vmatprep.subr.bf16.mxu1 %v2792_v17  ;;  %v2871_v14 = vld [vmem:[%s4050_s1 + $0x228] ss:$16 sps:$4 sm:$0xff]   ;;  %v2967_v17 = vld [vmem:[%s4050_s1 + $0x60c] ss:$16 sps:$4 sm:$0xff]  }
  0x4d   :  { %1364 = vmatprep.subr.bf16.mxu0 %v2789_v16  ;;  %v3091_v16 = vmov 0  }
  0x4f   :  { %1451 = vmatpush1.bf16.msra.mxu1 %v2790_v19  ;;  %v2880_v19 = vld [vmem:[%s4051_s0 + $0x18] ss:$28 sps:$4 sm:$0xff]  }
  0x50   :  { %1365 = vmatpush1.bf16.msra.mxu0 %v2787_v18  ;;  %1452 = vmatprep.subr.bf16.mxu1 %v2798_v21  ;;  %v2883_v18 = vld [vmem:[%s4050_s1 + $0x26c] ss:$16 sps:$4 sm:$0xff]  }
  0x51   :  { %1366 = vmatprep.subr.bf16.mxu0 %v2795_v20  ;;  %v2965_v20 = vld [vmem:[%s4050_s1 + $0x608] ss:$16 sps:$4 sm:$0xff]   ;;  %v2886_v21 = vld [vmem:[%s4050_s1 + $0x28c] ss:$16 sps:$4 sm:$0xff]  }
  0x53   :  { %1453 = vmatpush1.bf16.msra.mxu1 %v2796_v23  ;;  %v2889_v23 = vld [vmem:[%s4050_s1 + $0x2ac] ss:$16 sps:$4 sm:$0xff]  }
  0x54   :  { %1367 = vmatpush1.bf16.msra.mxu0 %v2793_v22  ;;  %1454 = vmatprep.subr.bf16.mxu1 %v2804_v25  ;;  %v2884_v22 = vld [vmem:[%s4050_s1 + $0x288] ss:$16 sps:$4 sm:$0xff]   ;;  %v2892_v25 = vld [vmem:[%s4050_s1 + $0x2cc] ss:$16 sps:$4 sm:$0xff]  }
  0x55   :  { %1368 = vmatprep.subr.bf16.mxu0 %v2801_v24  ;;  %v2887_v24 = vld [vmem:[%s4050_s1 + $0x2a8] ss:$16 sps:$4 sm:$0xff]  }
  0x57   :  { %1455 = vmatpush1.bf16.msra.mxu1 %v2802_v27  ;;  %v2895_v27 = vld [vmem:[%s4050_s1 + $0x2ec] ss:$16 sps:$4 sm:$0xff]  }
  0x58   :  { %1369 = vmatpush1.bf16.msra.mxu0 %v2799_v26  ;;  %1456 = vmatprep.subr.bf16.mxu1 %v2810_v29  ;;  %v2890_v26 = vld [vmem:[%s4050_s1 + $0x2c8] ss:$16 sps:$4 sm:$0xff]  }
  0x59   :  { %1370 = vmatprep.subr.bf16.mxu0 %v2807_v28  ;;  %v2893_v28 = vld [vmem:[%s4050_s1 + $0x2e8] ss:$16 sps:$4 sm:$0xff]  }
  0x5a   :  { %v2971_v29 = vld [vmem:[%s4052_s3] ss:$8 sps:$4 sm:$0xff]  }
  0x5b   :  { %1457 = vmatpush1.bf16.msra.mxu1 %v2808_v31  ;;  %v2898_v31 = vld [vmem:[%s4050_s1 + $0x30c] ss:$16 sps:$4 sm:$0xff]  }
  0x5c   :  { %1371 = vmatpush1.bf16.msra.mxu0 %v2805_v30  ;;  %1458 = vmatprep.subr.bf16.mxu1 %v2816_v33  ;;  %v2973_v30 = vld [vmem:[%s4052_s3 + $0x4] ss:$8 sps:$4 sm:$0xff]   ;;  %v2896_v33 = vld [vmem:[%s4050_s1 + $0x308] ss:$16 sps:$4 sm:$0xff]  }
  0x5d   :  { %1372 = vmatprep.subr.bf16.mxu0 %v2813_v32  ;;  %v2976_v32 = vld [vmem:[%s4052_s3 + $0x14] ss:$8 sps:$4 sm:$0xff]  }
  0x5f   :  { %1459 = vmatpush1.bf16.msra.mxu1 %v2814_v36  ;;  %v2979_v36 = vld [vmem:[%s4052_s3 + $0x24] ss:$8 sps:$4 sm:$0xff]  }
  0x60   :  { %1373 = vmatpush1.bf16.msra.mxu0 %v2811_v35  ;;  %1460 = vmatprep.subr.bf16.mxu1 %v2822_v38  ;;  %v2974_v35 = vld [vmem:[%s4052_s3 + $0x10] ss:$8 sps:$4 sm:$0xff]  }
  0x61   :  { %1374 = vmatprep.subr.bf16.mxu0 %v2819_v37  ;;  %v2901_v37 = vld [vmem:[%s4050_s1 + $0x32c] ss:$16 sps:$4 sm:$0xff]   ;;  %v2899_v38 = vld [vmem:[%s4050_s1 + $0x328] ss:$16 sps:$4 sm:$0xff]  }
  0x63   :  { %1461 = vmatpush1.bf16.msra.mxu1 %v2820_v40  ;;  %v2982_v40 = vld [vmem:[%s4052_s3 + $0x34] ss:$8 sps:$4 sm:$0xff]  }
  0x64   :  { %1375 = vmatpush1.bf16.msra.mxu0 %v2817_v39  ;;  %1462 = vmatprep.subr.bf16.mxu1 %v2828_v42  ;;  %v2977_v39 = vld [vmem:[%s4052_s3 + $0x20] ss:$8 sps:$4 sm:$0xff]  }
  0x65   :  { %1376 = vmatprep.subr.bf16.mxu0 %v2825_v41  ;;  %v2904_v41 = vld [vmem:[%s4050_s1 + $0x34c] ss:$16 sps:$4 sm:$0xff]   ;;  %v2902_v42 = vld [vmem:[%s4050_s1 + $0x348] ss:$16 sps:$4 sm:$0xff]  }
  0x67   :  { %1463 = vmatpush1.bf16.msra.mxu1 %v2826_v44  ;;  %v2985_v44 = vld [vmem:[%s4052_s3 + $0x44] ss:$8 sps:$4 sm:$0xff]  }
  0x68   :  { %1377 = vmatpush1.bf16.msra.mxu0 %v2823_v43  ;;  %1464 = vmatprep.subr.bf16.mxu1 %v2834_v46  ;;  %v2980_v43 = vld [vmem:[%s4052_s3 + $0x30] ss:$8 sps:$4 sm:$0xff]  }
  0x69   :  { %1378 = vmatprep.subr.bf16.mxu0 %v2831_v45  ;;  %v2907_v45 = vld [vmem:[%s4050_s1 + $0x36c] ss:$16 sps:$4 sm:$0xff]   ;;  %v2905_v46 = vld [vmem:[%s4050_s1 + $0x368] ss:$16 sps:$4 sm:$0xff]  }
  0x6b   :  { %1465 = vmatpush1.bf16.msra.mxu1 %v2832_v48  ;;  %v2988_v48 = vld [vmem:[%s4052_s3 + $0x54] ss:$8 sps:$4 sm:$0xff]  }
  0x6c   :  { %1379 = vmatpush1.bf16.msra.mxu0 %v2829_v47  ;;  %1466 = vmatprep.subr.bf16.mxu1 %v2840_v50  ;;  %v2983_v47 = vld [vmem:[%s4052_s3 + $0x40] ss:$8 sps:$4 sm:$0xff]   ;;  %v2986_v50 = vld [vmem:[%s4052_s3 + $0x50] ss:$8 sps:$4 sm:$0xff]  }
  0x6d   :  { %1380 = vmatprep.subr.bf16.mxu0 %v2837_v49  ;;  %v2910_v49 = vld [vmem:[%s4050_s1 + $0x38c] ss:$16 sps:$4 sm:$0xff]  }
  0x6f   :  { %1467 = vmatpush1.bf16.msra.mxu1 %v2838_v53  ;;  %v2991_v53 = vld [vmem:[%s4052_s3 + $0x64] ss:$8 sps:$4 sm:$0xff]  }
  0x70   :  { %1381 = vmatpush1.bf16.msra.mxu0 %v2835_v52  ;;  %1468 = vmatprep.subr.bf16.mxu1 %v2846_v55  ;;  %v2908_v52 = vld [vmem:[%s4050_s1 + $0x388] ss:$16 sps:$4 sm:$0xff]  }
  0x71   :  { %1382 = vmatprep.subr.bf16.mxu0 %v2843_v54  ;;  %v2913_v54 = vld [vmem:[%s4050_s1 + $0x3ac] ss:$16 sps:$4 sm:$0xff]   ;;  %v2989_v55 = vld [vmem:[%s4052_s3 + $0x60] ss:$8 sps:$4 sm:$0xff]  }
  0x73   :  { %1469 = vmatpush1.bf16.msra.mxu1 %v2844_v57  ;;  %v2994_v57 = vld [vmem:[%s4052_s3 + $0x74] ss:$8 sps:$4 sm:$0xff]  }
  0x74   :  { %1383 = vmatpush1.bf16.msra.mxu0 %v2841_v56  ;;  %1470 = vmatprep.subr.bf16.mxu1 %v2852_v59  ;;  %v2911_v56 = vld [vmem:[%s4050_s1 + $0x3a8] ss:$16 sps:$4 sm:$0xff]  }
  0x75   :  { %1384 = vmatprep.subr.bf16.mxu0 %v2849_v58  ;;  %v2916_v58 = vld [vmem:[%s4050_s1 + $0x3cc] ss:$16 sps:$4 sm:$0xff]   ;;  %v2992_v59 = vld [vmem:[%s4052_s3 + $0x70] ss:$8 sps:$4 sm:$0xff]  }
  0x77   :  { %1471 = vmatpush1.bf16.msra.mxu1 %v2850_v61  ;;  %v2997_v61 = vld [vmem:[%s4052_s3 + $0x84] ss:$8 sps:$4 sm:$0xff]  }
  0x78   :  { %1385 = vmatpush1.bf16.msra.mxu0 %v2847_v60  ;;  %1472 = vmatprep.subr.bf16.mxu1 %v2858_v63  ;;  %v2914_v60 = vld [vmem:[%s4050_s1 + $0x3c8] ss:$16 sps:$4 sm:$0xff]  }
  0x79   :  { %1386 = vmatprep.subr.bf16.mxu0 %v2855_v62  ;;  %v2919_v62 = vld [vmem:[%s4050_s1 + $0x3ec] ss:$16 sps:$4 sm:$0xff]   ;;  %v2995_v63 = vld [vmem:[%s4052_s3 + $0x80] ss:$8 sps:$4 sm:$0xff]  }
  0x7b   :  { %1473 = vmatpush1.bf16.msra.mxu1 %v2856_v1  ;;  %v3000_v1 = vld [vmem:[%s4052_s3 + $0x94] ss:$8 sps:$4 sm:$0xff]  }
  0x7c   :  { %1387 = vmatpush1.bf16.msra.mxu0 %v2853_v0  ;;  %1474 = vmatprep.subr.bf16.mxu1 %v2864_v3  ;;  %v2917_v0 = vld [vmem:[%s4050_s1 + $0x3e8] ss:$16 sps:$4 sm:$0xff]  }
  0x7d   :  { %1388 = vmatprep.subr.bf16.mxu0 %v2861_v2  ;;  %v2922_v2 = vld [vmem:[%s4050_s1 + $0x40c] ss:$16 sps:$4 sm:$0xff]   ;;  %v2998_v3 = vld [vmem:[%s4052_s3 + $0x90] ss:$8 sps:$4 sm:$0xff]  }
  0x7f   :  { %1475 = vmatpush1.bf16.msra.mxu1 %v2862_v7  ;;  %v2925_v7 = vld [vmem:[%s4050_s1 + $0x42c] ss:$16 sps:$4 sm:$0xff]  }
  0x80   :  { %1389 = vmatpush1.bf16.msra.mxu0 %v2859_v6  ;;  %1487 = vmatprep.subr.bf16.mxu1 %v2870_v8  ;;  %v2920_v6 = vld [vmem:[%s4050_s1 + $0x408] ss:$16 sps:$4 sm:$0xff]   ;;  %v3003_v8 = vld [vmem:[%s4052_s3 + $0xa4] ss:$8 sps:$4 sm:$0xff]  }
  0x81   :  { %1401 = vmatprep.subr.bf16.mxu0 %v2876_v9  ;;  %v3001_v9 = vld [vmem:[%s4052_s3 + $0xa0] ss:$8 sps:$4 sm:$0xff]  }
  0x82   :  { %1477 = vmatmul.mubr.bf16.vlgmr.msra.gmra.mrb[4].mxu1 %v3342_v4  ;;  %v2877_v4 = vld [vmem:[%s4050_s1 + $0x248] ss:$16 sps:$4 sm:$0xff]  }
  0x83   :  { %1391 = vmatmul.mubr.bf16.vlgmr.msra.gmra.mrb[0].mxu0 %v3552_v10  ;;  %1488 = vmatpush1.bf16.msra.mxu1 %v2868_v11  ;;  %v2923_v11 = vld [vmem:[%s4050_s1 + $0x428] ss:$16 sps:$4 sm:$0xff]  }
  0x84   :  { %1402 = vmatpush1.bf16.msra.mxu0 %v2874_v12  ;;  %1489 = vmatprep.subr.bf16.mxu1 %v2873_v13  ;;  %v3006_v12 = vld [vmem:[%s4052_s3 + $0xb4] ss:$8 sps:$4 sm:$0xff]   ;;  %v3004_v13 = vld [vmem:[%s4052_s3 + $0xb0] ss:$8 sps:$4 sm:$0xff]  }
  0x85   :  { %1433 = vmatprep.mubr.bf16.mxu0 %v3091_v16  ;;  %1519 = vmatprep.mubr.bf16.mxu1 %v3288_v51  ;;  %v2881_v51 = vld [vmem:[%s4050_s1 + $0x268] ss:$16 sps:$4 sm:$0xff]  }
  0x86   :  { %1573 = vmatprep.subr.bf16.mxu0 %v2967_v17  ;;  %v2929_v17 = vld [vmem:[%s4050_s1 + $0x468] ss:$16 sps:$4 sm:$0xff]  }
  0x87   :  { %1490 = vmatpush1.bf16.msra.mxu1 %v2871_v14  ;;  %v3009_v14 = vld [vmem:[%s4052_s3 + $0xc4] ss:$8 sps:$4 sm:$0xff]  }
  0x88   :  { %1491 = vmatprep.subr.bf16.mxu1 %v2879_v15  ;;  %v2931_v15 = vld [vmem:[%s4050_s1 + $0x46c] ss:$16 sps:$4 sm:$0xff]  }
  0x8b   :  { %1492 = vmatpush1.bf16.msra.mxu1 %v2877_v4  ;;  %v3012_v4 = vld [vmem:[%s4052_s3 + $0xd4] ss:$8 sps:$4 sm:$0xff]  }
  0x8c   :  { %1493 = vmatprep.subr.bf16.mxu1 %v2883_v18  ;;  %v2934_v18 = vld [vmem:[%s4050_s1 + $0x48c] ss:$16 sps:$4 sm:$0xff]  }
  0x8f   :  { %2521 = vmatmul.mubr.msk.bf16.vlgmr.msra.gmra.mrb[0].mxu0 %vm1268_vm0, %v2880_v19  ;;  %1494 = vmatpush1.bf16.msra.mxu1 %v2881_v51  ;;  %v2932_v51 = vld [vmem:[%s4050_s1 + $0x488] ss:$16 sps:$4 sm:$0xff]  }
  0x90   :  { %1574 = vmatpush1.bf16.msra.mxu0 %v2965_v20  ;;  %1495 = vmatprep.subr.bf16.mxu1 %v2886_v21  ;;  %v2937_v20 = vld [vmem:[%s4050_s1 + $0x4ac] ss:$16 sps:$4 sm:$0xff]   ;;  %v2935_v21 = vld [vmem:[%s4050_s1 + $0x4a8] ss:$16 sps:$4 sm:$0xff]  }
  0x91   :  { %1605 = vmatprep.mubr.bf16.mxu0 %v3091_v16  ;;  %2024 = vmatprep.subr.bf16.mxu0 %v2973_v30  ;;  %v3007_v16 = vld [vmem:[%s4052_s3 + $0xc0] ss:$8 sps:$4 sm:$0xff]  }
  0x92   :  { %v2947_v30 = vld [vmem:[%s4050_s1 + $0x528] ss:$16 sps:$4 sm:$0xff]  }
  0x93   :  { %1496 = vmatpush1.bf16.msra.mxu1 %v2884_v22  ;;  %v2940_v22 = vld [vmem:[%s4050_s1 + $0x4cc] ss:$16 sps:$4 sm:$0xff]  }
  0x94   :  { %1497 = vmatprep.subr.bf16.mxu1 %v2889_v23  ;;  %v2938_v23 = vld [vmem:[%s4050_s1 + $0x4c8] ss:$16 sps:$4 sm:$0xff]  }
  0x97   :  { %2522 = vmatmul.mubr.msk.bf16.vlgmr.msra.gmra.mrb[4].mxu0 %vm1268_vm0, %v2880_v19  ;;  %1498 = vmatpush1.bf16.msra.mxu1 %v2887_v24  ;;  %v3010_v19 = vld [vmem:[%s4052_s3 + $0xd0] ss:$8 sps:$4 sm:$0xff]   ;;  %v2943_v24 = vld [vmem:[%s4050_s1 + $0x4ec] ss:$16 sps:$4 sm:$0xff]  }
  0x98   :  { %1499 = vmatprep.subr.bf16.mxu1 %v2892_v25  ;;  %2025 = vmatpush1.bf16.msra.mxu0 %v2971_v29  ;;  %v2941_v25 = vld [vmem:[%s4050_s1 + $0x4e8] ss:$16 sps:$4 sm:$0xff]   ;;  %v3015_v29 = vld [vmem:[%s4052_s3 + $0xe4] ss:$8 sps:$4 sm:$0xff]  }
  0x99   :  { %2026 = vmatprep.subr.bf16.mxu0 %v2976_v32  ;;  %v2952_v32 = vld [vmem:[%s4050_s1 + $0x54c] ss:$16 sps:$4 sm:$0xff]  }
  0x9b   :  { %1500 = vmatpush1.bf16.msra.mxu1 %v2890_v26  ;;  %v2946_v26 = vld [vmem:[%s4050_s1 + $0x50c] ss:$16 sps:$4 sm:$0xff]  }
  0x9c   :  { %1501 = vmatprep.subr.bf16.mxu1 %v2895_v27  ;;  %2027 = vmatpush1.bf16.msra.mxu0 %v2974_v35  ;;  %v2944_v27 = vld [vmem:[%s4050_s1 + $0x508] ss:$16 sps:$4 sm:$0xff]  }
  0x9d   :  { %2028 = vmatprep.subr.bf16.mxu0 %v2979_v36  ;;  %v2950_v35 = vld [vmem:[%s4050_s1 + $0x548] ss:$16 sps:$4 sm:$0xff]  }
  0x9e   :  { %v3016_v36 = vld [vmem:[%s4052_s3 + $0xf0] ss:$8 sps:$4 sm:$0xff]  }
  0x9f   :  { %1502 = vmatpush1.bf16.msra.mxu1 %v2893_v28  ;;  %v2949_v28 = vld [vmem:[%s4050_s1 + $0x52c] ss:$16 sps:$4 sm:$0xff]  }
  0xa0   :  { %1503 = vmatprep.subr.bf16.mxu1 %v2898_v31  ;;  %2029 = vmatpush1.bf16.msra.mxu0 %v2977_v39  ;;  %v3013_v31 = vld [vmem:[%s4052_s3 + $0xe0] ss:$8 sps:$4 sm:$0xff]   ;;  %v2958_v39 = vld [vmem:[%s4050_s1 + $0x58c] ss:$16 sps:$4 sm:$0xff]  }
  0xa1   :  { %2030 = vmatprep.subr.bf16.mxu0 %v2982_v40  ;;  %v3021_v40 = vld [vmem:[%s4052_s3 + $0x104] ss:$8 sps:$4 sm:$0xff]  }
  0xa3   :  { %1504 = vmatpush1.bf16.msra.mxu1 %v2896_v33  ;;  %v3018_v33 = vld [vmem:[%s4052_s3 + $0xf4] ss:$8 sps:$4 sm:$0xff]  }
  0xa4   :  { %1505 = vmatprep.subr.bf16.mxu1 %v2901_v37  ;;  %2031 = vmatpush1.bf16.msra.mxu0 %v2980_v43  ;;  %v2955_v37 = vld [vmem:[%s4050_s1 + $0x56c] ss:$16 sps:$4 sm:$0xff]   ;;  %v2959_v43 = vld [vmem:[%s4050_s1 + $0x5a8] ss:$16 sps:$4 sm:$0xff]  }
  0xa5   :  { %2032 = vmatprep.subr.bf16.mxu0 %v2985_v44  ;;  %v2964_v44 = vld [vmem:[%s4050_s1 + $0x5cc] ss:$16 sps:$4 sm:$0xff]  }
  0xa7   :  { %1506 = vmatpush1.bf16.msra.mxu1 %v2899_v38  ;;  %v2953_v38 = vld [vmem:[%s4050_s1 + $0x568] ss:$16 sps:$4 sm:$0xff]  }
  0xa8   :  { %1507 = vmatprep.subr.bf16.mxu1 %v2904_v41  ;;  %2033 = vmatpush1.bf16.msra.mxu0 %v2983_v47  ;;  %v2956_v41 = vld [vmem:[%s4050_s1 + $0x588] ss:$16 sps:$4 sm:$0xff]  }
  0xa9   :  { %2034 = vmatprep.subr.bf16.mxu0 %v2988_v48  ;;  %v2968_v47 = vld [vmem:[%s4050_s1 + $0x5e8] ss:$16 sps:$4 sm:$0xff]  }
  0xab   :  { %1508 = vmatpush1.bf16.msra.mxu1 %v2902_v42  ;;  %v2961_v42 = vld [vmem:[%s4050_s1 + $0x5ac] ss:$16 sps:$4 sm:$0xff]  }
  0xac   :  { %1509 = vmatprep.subr.bf16.mxu1 %v2907_v45  ;;  %2035 = vmatpush1.bf16.msra.mxu0 %v2986_v50  ;;  %v2962_v45 = vld [vmem:[%s4050_s1 + $0x5c8] ss:$16 sps:$4 sm:$0xff]  }
  0xad   :  { %2036 = vmatprep.subr.bf16.mxu0 %v2991_v53  ;;  %v233_v53 = vlaneseq }
  0xaf   :  { %1510 = vmatpush1.bf16.msra.mxu1 %v2905_v46  ;;  %v2970_v46 = vld [vmem:[%s4050_s1 + $0x5ec] ss:$16 sps:$4 sm:$0xff]  }
  0xb0   :  { %1511 = vmatprep.subr.bf16.mxu1 %v2910_v49  ;;  %2037 = vmatpush1.bf16.msra.mxu0 %v2989_v55 }
  0xb1   :  { %2038 = vmatprep.subr.bf16.mxu0 %v2994_v57 }
  0xb3   :  { %1512 = vmatpush1.bf16.msra.mxu1 %v2908_v52 }
  0xb4   :  { %1513 = vmatprep.subr.bf16.mxu1 %v2913_v54  ;;  %2039 = vmatpush1.bf16.msra.mxu0 %v2992_v59  ;;  %v3862_v54 = vshrl.u32 %v233_v53, 7  ;;  %v3055_v53 = vld [vmem:[%s4052_s3 + $0x1c0] ss:$8 sps:$4 sm:$0xff]  }
  0xb5   :  { %2040 = vmatprep.subr.bf16.mxu0 %v2997_v61 }
  0xb6   :  { %v235_v55 = vsub.s32 0, %v3862_v54  ;;  %v239_v57 = vsub.s32 1, %v3862_v54 }
  0xb7   :  { %1514 = vmatpush1.bf16.msra.mxu1 %v2911_v56  ;;  %v3868_v56 = vld [vmem:[%s4053_s2] sm:$0xf] }
  0xb8   :  { %1515 = vmatprep.subr.bf16.mxu1 %v2916_v58  ;;  %2041 = vmatpush1.bf16.msra.mxu0 %v2995_v63  ;;  %v240_v58 = vrot.slane %v3868_v56, %v239_v57 }
  0xb9   :  { %2042 = vmatprep.subr.bf16.mxu0 %v3000_v1 }
  0xbb   :  { %1516 = vmatpush1.bf16.msra.mxu1 %v2914_v60 }
  0xbc   :  { %1517 = vmatprep.subr.bf16.mxu1 %v2919_v62  ;;  %2043 = vmatpush1.bf16.msra.mxu0 %v2998_v3 }
  0xbd   :  { %2044 = vmatprep.subr.bf16.mxu0 %v3003_v8 }
  0xbf   :  { %1518 = vmatpush1.bf16.msra.mxu1 %v2917_v0 }
  0xc0   :  { %1530 = vmatprep.subr.bf16.mxu1 %v2922_v2  ;;  %2045 = vmatpush1.bf16.msra.mxu0 %v3001_v9 }
  0xc1   :  { %2046 = vmatprep.subr.bf16.mxu0 %v3006_v12 }
  0xc2   :  { %1520 = vmatmul.mubr.bf16.vlgmr.msra.gmra.mrb[4].mxu1 %v3347_v5  ;;  %v2928_v5 = vld [vmem:[%s4050_s1 + $0x44c] ss:$16 sps:$4 sm:$0xff]  }
  0xc3   :  { %1531 = vmatpush1.bf16.msra.mxu1 %v2920_v6  ;;  %1562 = vmatprep.mubr.bf16.mxu1 %v3438_v34  ;;  %v2926_v34 = vld [vmem:[%s4050_s1 + $0x448] ss:$16 sps:$4 sm:$0xff]   ;;  %v3067_v6 = vld [vmem:[%s4054_s5 + $0x40] sm:$0xff]  }
  0xc4   :  { %1532 = vmatprep.subr.bf16.mxu1 %v2925_v7  ;;  %2047 = vmatpush1.bf16.msra.mxu0 %v3004_v13 }
  0xc5   :  { %2048 = vmatprep.subr.bf16.mxu0 %v3009_v14 }
  0xc7   :  { %1533 = vmatpush1.bf16.msra.mxu1 %v2923_v11 }
  0xc8   :  { %1534 = vmatprep.subr.bf16.mxu1 %v2928_v5  ;;  %2049 = vmatpush1.bf16.msra.mxu0 %v3007_v16  ;;  %v3068_v5 = vld [vmem:[%s4054_s5] sm:$0xff]   ;;  %v3070_v16 = vld [vmem:[%s4054_s5 + $0x8] sm:$0xff]  }
  0xc9   :  { %2050 = vmatprep.subr.bf16.mxu0 %v3012_v4  ;;  %v3024_v4 = vld [vmem:[%s4052_s3 + $0x114] ss:$8 sps:$4 sm:$0xff]  }
  0xcb   :  { %1535 = vmatpush1.bf16.msra.mxu1 %v2926_v34  ;;  %v3069_v34 = vld [vmem:[%s4054_s5 + $0x48] sm:$0xff]  }
  0xcc   :  { %1536 = vmatprep.subr.bf16.mxu1 %v2931_v15  ;;  %2051 = vmatpush1.bf16.msra.mxu0 %v3010_v19  ;;  %v3019_v15 = vld [vmem:[%s4052_s3 + $0x100] ss:$8 sps:$4 sm:$0xff]  }
  0xcd   :  { %2052 = vmatprep.subr.bf16.mxu0 %v3015_v29  ;;  %v3025_v29 = vld [vmem:[%s4052_s3 + $0x120] ss:$8 sps:$4 sm:$0xff]  }
  0xcf   :  { %1537 = vmatpush1.bf16.msra.mxu1 %v2929_v17 }
  0xd0   :  { %1538 = vmatprep.subr.bf16.mxu1 %v2934_v18  ;;  %2053 = vmatpush1.bf16.msra.mxu0 %v3013_v31  ;;  %v3071_v18 = vld [vmem:[%s4054_s5 + $0x50] sm:$0xff]   ;;  %v3076_v31 = vld [vmem:[%s4054_s5 + $0x20] sm:$0xff]  }
  0xd1   :  { %2054 = vmatprep.subr.bf16.mxu0 %v3018_v33  ;;  %v3028_v33 = vld [vmem:[%s4052_s3 + $0x130] ss:$8 sps:$4 sm:$0xff]  }
  0xd3   :  { %1539 = vmatpush1.bf16.msra.mxu1 %v2932_v51 }
  0xd4   :  { %1540 = vmatprep.subr.bf16.mxu1 %v2937_v20  ;;  %2055 = vmatpush1.bf16.msra.mxu0 %v3016_v36  ;;  %v3031_v36 = vld [vmem:[%s4052_s3 + $0x140] ss:$8 sps:$4 sm:$0xff]  }
  0xd5   :  { %2067 = vmatprep.subr.bf16.mxu0 %v3021_v40  ;;  %v3037_v40 = vld [vmem:[%s4052_s3 + $0x160] ss:$8 sps:$4 sm:$0xff]  }
  0xd7   :  { %1541 = vmatpush1.bf16.msra.mxu1 %v2935_v21  ;;  %v3022_v21 = vld [vmem:[%s4052_s3 + $0x110] ss:$8 sps:$4 sm:$0xff]  }
  0xd8   :  { %1542 = vmatprep.subr.bf16.mxu1 %v2940_v22 }
  0xdb   :  { %1543 = vmatpush1.bf16.msra.mxu1 %v2938_v23  ;;  %v3072_v23 = vld [vmem:[%s4054_s5 + $0x10] sm:$0xff]  }
  0xdc   :  { %1544 = vmatprep.subr.bf16.mxu1 %v2943_v24 }
  0xdf   :  { %1545 = vmatpush1.bf16.msra.mxu1 %v2941_v25  ;;  %v3073_v25 = vld [vmem:[%s4054_s5 + $0x58] sm:$0xff]  }
  0xe0   :  { %1546 = vmatprep.subr.bf16.mxu1 %v2946_v26  ;;  %v3027_v26 = vld [vmem:[%s4052_s3 + $0x124] ss:$8 sps:$4 sm:$0xff]  }
  0xe3   :  { %1547 = vmatpush1.bf16.msra.mxu1 %v2944_v27  ;;  %v3074_v27 = vld [vmem:[%s4054_s5 + $0x18] sm:$0xff]  }
  0xe4   :  { %1548 = vmatprep.subr.bf16.mxu1 %v2949_v28  ;;  %v3075_v28 = vld [vmem:[%s4054_s5 + $0x60] sm:$0xff]  }
  0xe7   :  { %1549 = vmatpush1.bf16.msra.mxu1 %v2947_v30  ;;  %v3030_v30 = vld [vmem:[%s4052_s3 + $0x134] ss:$8 sps:$4 sm:$0xff]  }
  0xe8   :  { %1550 = vmatprep.subr.bf16.mxu1 %v2952_v32  ;;  %v3077_v32 = vld [vmem:[%s4054_s5 + $0x68] sm:$0xff]  }
  0xeb   :  { %1551 = vmatpush1.bf16.msra.mxu1 %v2950_v35  ;;  %v3033_v35 = vld [vmem:[%s4052_s3 + $0x144] ss:$8 sps:$4 sm:$0xff]  }
  0xec   :  { %1552 = vmatprep.subr.bf16.mxu1 %v2955_v37  ;;  %v3036_v37 = vld [vmem:[%s4052_s3 + $0x154] ss:$8 sps:$4 sm:$0xff]  }
  0xef   :  { %1553 = vmatpush1.bf16.msra.mxu1 %v2953_v38  ;;  %v3034_v38 = vld [vmem:[%s4052_s3 + $0x150] ss:$8 sps:$4 sm:$0xff]  }
  0xf0   :  { %1554 = vmatprep.subr.bf16.mxu1 %v2958_v39  ;;  %v3039_v39 = vld [vmem:[%s4052_s3 + $0x164] ss:$8 sps:$4 sm:$0xff]  }
  0xf3   :  { %1555 = vmatpush1.bf16.msra.mxu1 %v2956_v41  ;;  %v3042_v41 = vld [vmem:[%s4052_s3 + $0x174] ss:$8 sps:$4 sm:$0xff]  }
  0xf4   :  { %1556 = vmatprep.subr.bf16.mxu1 %v2961_v42  ;;  %v3040_v42 = vld [vmem:[%s4052_s3 + $0x170] ss:$8 sps:$4 sm:$0xff]  }
  0xf7   :  { %1557 = vmatpush1.bf16.msra.mxu1 %v2959_v43  ;;  %v3045_v43 = vld [vmem:[%s4052_s3 + $0x184] ss:$8 sps:$4 sm:$0xff]  }
  0xf8   :  { %1558 = vmatprep.subr.bf16.mxu1 %v2964_v44  ;;  %v3043_v44 = vld [vmem:[%s4052_s3 + $0x180] ss:$8 sps:$4 sm:$0xff]  }
  0xfb   :  { %1559 = vmatpush1.bf16.msra.mxu1 %v2962_v45  ;;  %v3048_v45 = vld [vmem:[%s4052_s3 + $0x194] ss:$8 sps:$4 sm:$0xff]  }
  0xfc   :  { %1560 = vmatprep.subr.bf16.mxu1 %v2970_v46  ;;  %v3046_v46 = vld [vmem:[%s4052_s3 + $0x190] ss:$8 sps:$4 sm:$0xff]  }
  0xff   :  { %1561 = vmatpush1.bf16.msra.mxu1 %v2968_v47  ;;  %v3051_v47 = vld [vmem:[%s4052_s3 + $0x1a4] ss:$8 sps:$4 sm:$0xff]  }
 0x100   :  { %2604 = vmatprep.subr.bf16.mxu1 %v3067_v6 }
 0x102   :  { %1563 = vmatmul.mubr.bf16.vlgmr.msra.gmra.mrb[4].mxu1 %v3552_v10  ;;  %v236_v10 = vrot.slane %v3868_v56, %v235_v55 }
 0x103   :  { %2605 = vmatpush3.bf16.msra.mxu1 %v3068_v5 }
 0x104   :  { %2606 = vmatprep.subr.bf16.mxu1 %v3069_v34 }
 0x107   :  { %2607 = vmatpush3.bf16.msra.mxu1 %v3070_v16 }
 0x108   :  { %2608 = vmatprep.subr.bf16.mxu1 %v3071_v18 }
 0x10b   :  { %2609 = vmatpush3.bf16.msra.mxu1 %v3072_v23  ;;  %v3082_v23 = vld [vmem:[%s4054_s5 + $0x38] sm:$0xff]  }
 0x10c   :  { %2610 = vmatprep.subr.bf16.mxu1 %v3073_v25 }
 0x10f   :  { %2611 = vmatpush3.bf16.msra.mxu1 %v3074_v27 }
 0x110   :  { %2612 = vmatprep.subr.bf16.mxu1 %v3075_v28 }
 0x113   :  { %2613 = vmatpush3.bf16.msra.mxu1 %v3076_v31 }
 0x114   :  { %2614 = vmatprep.subr.bf16.mxu1 %v3077_v32 }
 0x115   :  { %v1306_v48 = vpop.f32.mrb[0].mxu1 }
 0x116   :  { %v1308_v49 = vpop.f32.mrb[1].mxu1  ;;  %v1307_v59 = vadd.f32 %v1306_v48, %v236_v10  ;;  %v3049_v48 = vld [vmem:[%s4052_s3 + $0x1a0] ss:$8 sps:$4 sm:$0xff]  }
 0x117   :  { %v1310_v50 = vpop.f32.mrb[2].mxu1  ;;  %v1309_v60 = vadd.f32 %v1308_v49, %v240_v58  ;;  %v3054_v49 = vld [vmem:[%s4052_s3 + $0x1b4] ss:$8 sps:$4 sm:$0xff]  }
 0x118   :  { %v1312_v52 = vpop.f32.mrb[3].mxu1  ;;  %v1311_v62 = vadd.f32 %v1310_v50, %v236_v10  ;;  %v3052_v50 = vld [vmem:[%s4052_s3 + $0x1b0] ss:$8 sps:$4 sm:$0xff]   ;;  %v3060_v10 = vld [vmem:[%s4052_s3 + $0x1d4] ss:$8 sps:$4 sm:$0xff]  }
 0x119   :  { %v1313_v1 = vadd.f32 %v1312_v52, %v240_v58  ;;  %v3057_v52 = vld [vmem:[%s4052_s3 + $0x1c4] ss:$8 sps:$4 sm:$0xff]   ;;  %v3058_v58 = vld [vmem:[%s4052_s3 + $0x1d0] ss:$8 sps:$4 sm:$0xff]  }
 0x162   :  { %v1435_v61 = vpop.f32.mrb[0].mxu0 }
 0x163   :  { %v2627_v63 = vadd.f32 %v1435_v61, %v1307_v59  ;;  %v1437_v0 = vpop.f32.mrb[1].mxu0  ;;  %v3063_v59 = vld [vmem:[%s4052_s3 + $0x1e4] ss:$8 sps:$4 sm:$0xff]   ;;  %v3066_v61 = vld [vmem:[%s4052_s3 + $0x1f4] ss:$8 sps:$4 sm:$0xff]  }
 0x164   :  { %v2629_v2 = vadd.f32 %v1437_v0, %v1309_v60  ;;  %v1439_v3 = vpop.f32.mrb[2].mxu0  ;;  %v3061_v60 = vld [vmem:[%s4052_s3 + $0x1e0] ss:$8 sps:$4 sm:$0xff]   ;;  %v247_v0 = vsub.s32 3, %v3862_v54 }
 0x165   :  { %v1616_v7 = vmax.f32 %v2627_v63, 0.0  ;;  %v2631_v8 = vadd.f32 %v1439_v3, %v1311_v62  ;;  %v1441_v9 = vpop.f32.mrb[3].mxu0  ;;  %v3064_v62 = vld [vmem:[%s4052_s3 + $0x1f0] ss:$8 sps:$4 sm:$0xff]   ;;  %v243_v63 = vsub.s32 2, %v3862_v54 }
 0x166   :  { %v1617_v11 = vmax.f32 %v2629_v2, 0.0  ;;  %v2633_v12 = vadd.f32 %v1441_v9, %v1313_v1  ;;  %v248_v2 = vrot.slane %v3868_v56, %v247_v0  ;;  %v2587_v54 = vld [vmem:[%s4056_s6] ss:$0 sm:$0xff] }
 0x167   :  { %v1620_v13 = vmax.f32 %v2631_v8, 0.0  ;;  %v244_v1 = vrot.slane %v3868_v56, %v243_v63 }
 0x168   :  { %v1621_v14 = vmax.f32 %v2633_v12, 0.0 }
 0x169   :  { %v1624_v17 = vpack.c.bf16 %v1620_v13, %v1616_v7 }
 0x16a   :  { %v1625_v19 = vpack.c.bf16 %v1621_v14, %v1617_v11  ;;  %v3898_v51 = vpop.f32.mrb[4].mxu0 }
 0x16b   :  { %v3900_v20 = vpop.f32.mrb[5].mxu0 }
 0x16c   :  { %2056 = vmatprep.mubr.bf16.mxu0 %v1625_v19  ;;  %v3905_v22 = vpop.f32.mrb[6].mxu0 }
 0x16d   :  { %2057 = vmatmul.mubr.bf16.vlgmr.msra.gmra.mrb[8].mxu0 %v1624_v17  ;;  %v3910_v24 = vpop.f32.mrb[7].mxu0 }
 0x16e   :  { %2068 = vmatpush1.bf16.msra.mxu0 %v3019_v15 }
 0x16f   :  { %2069 = vmatprep.subr.bf16.mxu0 %v3024_v4 }
 0x172   :  { %2070 = vmatpush1.bf16.msra.mxu0 %v3022_v21  ;;  %v3080_v21 = vld [vmem:[%s4054_s5 + $0x30] sm:$0xff]  }
 0x173   :  { %2071 = vmatprep.subr.bf16.mxu0 %v3027_v26 }
 0x176   :  { %2072 = vmatpush1.bf16.msra.mxu0 %v3025_v29 }
 0x177   :  { %2073 = vmatprep.subr.bf16.mxu0 %v3030_v30 }
 0x17a   :  { %2074 = vmatpush1.bf16.msra.mxu0 %v3028_v33 }
 0x17b   :  { %2075 = vmatprep.subr.bf16.mxu0 %v3033_v35 }
 0x17e   :  { %2076 = vmatpush1.bf16.msra.mxu0 %v3031_v36 }
 0x17f   :  { %2077 = vmatprep.subr.bf16.mxu0 %v3036_v37 }
 0x182   :  { %2078 = vmatpush1.bf16.msra.mxu0 %v3034_v38 }
 0x183   :  { %2079 = vmatprep.subr.bf16.mxu0 %v3039_v39 }
 0x186   :  { %2080 = vmatpush1.bf16.msra.mxu0 %v3037_v40 }
 0x187   :  { %2081 = vmatprep.subr.bf16.mxu0 %v3042_v41 }
 0x18a   :  { %2082 = vmatpush1.bf16.msra.mxu0 %v3040_v42 }
 0x18b   :  { %2083 = vmatprep.subr.bf16.mxu0 %v3045_v43 }
 0x18e   :  { %2084 = vmatpush1.bf16.msra.mxu0 %v3043_v44 }
 0x18f   :  { %2085 = vmatprep.subr.bf16.mxu0 %v3048_v45 }
 0x192   :  { %2086 = vmatpush1.bf16.msra.mxu0 %v3046_v46 }
 0x193   :  { %2087 = vmatprep.subr.bf16.mxu0 %v3051_v47 }
 0x196   :  { %2088 = vmatpush1.bf16.msra.mxu0 %v3049_v48 }
 0x197   :  { %2089 = vmatprep.subr.bf16.mxu0 %v3054_v49 }
 0x19a   :  { %2090 = vmatpush1.bf16.msra.mxu0 %v3052_v50 }
 0x19b   :  { %2091 = vmatprep.subr.bf16.mxu0 %v3057_v52 }
 0x19e   :  { %2092 = vmatpush1.bf16.msra.mxu0 %v3055_v53 }
 0x19f   :  { %2093 = vmatprep.subr.bf16.mxu0 %v3060_v10 }
 0x1a2   :  { %2094 = vmatpush1.bf16.msra.mxu0 %v3058_v58 }
 0x1a3   :  { %2095 = vmatprep.subr.bf16.mxu0 %v3063_v59 }
 0x1a6   :  { %2096 = vmatpush1.bf16.msra.mxu0 %v3061_v60 }
 0x1a7   :  { %2097 = vmatprep.subr.bf16.mxu0 %v3066_v61 }
 0x1aa   :  { %2098 = vmatpush1.bf16.msra.mxu0 %v3064_v62 }
 0x1d5   :  { %v1564_v3 = vpop.f32.mrb[4].mxu1 }
 0x1d6   :  { %v2634_v6 = vadd.f32 %v1564_v3, %v244_v1  ;;  %v1566_v7 = vpop.f32.mrb[5].mxu1 }
 0x1d7   :  { %v2636_v8 = vadd.f32 %v1566_v7, %v248_v2  ;;  %v1568_v9 = vpop.f32.mrb[6].mxu1 }
 0x1d8   :  { %v2635_v11 = vadd.f32 %v2634_v6, %v3898_v51  ;;  %v2638_v12 = vadd.f32 %v1568_v9, %v244_v1  ;;  %v1570_v5 = vpop.f32.mrb[7].mxu1  ;;  %v3078_v51 = vld [vmem:[%s4054_s5 + $0x28] sm:$0xff]  }
 0x1d9   :  { %v2637_v13 = vadd.f32 %v2636_v8, %v3900_v20  ;;  %v2640_v34 = vadd.f32 %v1570_v5, %v248_v2  ;;  %2615 = vmatpush3.bf16.msra.mxu1 %v3078_v51  ;;  %v3079_v20 = vld [vmem:[%s4054_s5 + $0x70] sm:$0xff]  }
 0x1da   :  { %v2639_v14 = vadd.f32 %v2638_v12, %v3905_v22  ;;  %v1618_v16 = vmax.f32 %v2635_v11, 0.0  ;;  %2616 = vmatprep.subr.bf16.mxu1 %v3079_v20  ;;  %v3081_v22 = vld [vmem:[%s4054_s5 + $0x78] sm:$0xff]  }
 0x1db   :  { %v2641_v15 = vadd.f32 %v2640_v34, %v3910_v24  ;;  %v1619_v4 = vmax.f32 %v2637_v13, 0.0  ;;  %v1692_v24 = vld [vmem:[%s4055_s4] sm:$0x3] }
 0x1dc   :  { %v1622_v17 = vmax.f32 %v2639_v14, 0.0  ;;  %v1697_v25 = vrot.slane %v1692_v24, %v235_v55  ;;  %v1701_v26 = vrot.slane %v1692_v24, %v239_v57 }
 0x1dd   :  { %v1623_v56 = vmax.f32 %v2641_v15, 0.0  ;;  %2617 = vmatpush3.bf16.msra.mxu1 %v3080_v21 }
 0x1de   :  { %v1626_v18 = vpack.c.bf16 %v1622_v17, %v1618_v16  ;;  %2618 = vmatprep.subr.bf16.mxu1 %v3081_v22 }
 0x1df   :  { %v1627_v19 = vpack.c.bf16 %v1623_v56, %v1619_v4 }
 0x1e1   :  { %2099 = vmatprep.mubr.bf16.mxu0 %v1627_v19  ;;  %2619 = vmatpush3.bf16.msra.mxu1 %v3082_v23 }
 0x1e2   :  { %2100 = vmatmul.mubr.bf16.vlgmr.msra.gmra.mrb[8].mxu0 %v1626_v18 }
 0x2b5   :  { %v2101_v27 = vpop.f32.mrb[8].mxu0 }
 0x2b6   :  { %v2642_v28 = vadd.f32 %v2101_v27, %v1697_v25  ;;  %v2103_v29 = vpop.f32.mrb[9].mxu0 }
 0x2b7   :  { %v2643_v30 = vadd.f32 %v2103_v29, %v1701_v26  ;;  %v2105_v31 = vpop.f32.mrb[10].mxu0 }
 0x2b8   :  { %v2644_v32 = vadd.f32 %v2105_v31, %v1697_v25  ;;  %v2107_v33 = vpop.f32.mrb[11].mxu0  ;;  %v2110_v36 = vmax.f32 %v2642_v28, 0.0 }
 0x2b9   :  { %v2645_v35 = vadd.f32 %v2107_v33, %v1701_v26  ;;  %v2111_v38 = vmax.f32 %v2643_v30, 0.0 }
 0x2ba   :  { %v2112_v37 = vmax.f32 %v2644_v32, 0.0 }
 0x2bb   :  { %v2113_v39 = vmax.f32 %v2645_v35, 0.0 }
 0x2bc   :  { %v2114_v40 = vpack.c.bf16 %v2112_v37, %v2110_v36 }
 0x2bd   :  { %v2115_v41 = vpack.c.bf16 %v2113_v39, %v2111_v38 }
 0x2bf   :  { %2283 = vmatprep.mubr.bf16.mxu1 %v2115_v41 }
 0x2c0   :  { %2284 = vmatmul.mubr.bf16.vlgmr.msra.gmra.mrb[8].mxu1 %v2114_v40 }
 0x393   :  { %v2620_v55 = vpop.f32.mrb[8].mxu1 }
 0x394   :  { %v2621_v42 = vpop.f32.mrb[9].mxu1 }
 0x395   :  { %v2622_v57 = vadd.f32 %v2621_v42, %v2620_v55  ;;  %v2623_v43 = vpop.f32.mrb[10].mxu1 }
 0x396   :  { %v2624_v44 = vpop.f32.mrb[11].mxu1 }
 0x397   :  { %v2625_v45 = vadd.f32 %v2624_v44, %v2623_v43  ;;  %v2286_v46 = vadd.f32 %v2622_v57, %v2587_v54 }
 0x399   :  { %2292 = vmax.xlane.f32.xlu0 %v2286_v46  ;;  %v2289_v47 = vadd.f32 %v2625_v45, %v2587_v54 }
 0x39d   :  { %2294 = vmax.xlane.f32.xlu0 %v2289_v47 }
 0x426   :  { %v2293_v48 = vpop.xlane.xlu0 %2292 }
 0x427   :  { %v2296_v49 = vsub.f32 %v2286_v46, %v2293_v48 }
 0x429   :  { %v2298_v50 = vmul.f32 1.442695, %v2296_v49 }
 0x42a   :  { %v2295_v52 = vpop.xlane.xlu0 %2294 }
 0x42b   :  { %v2297_v53 = vsub.f32 %v2289_v47, %v2295_v52  ;;  %3083 = vpow2.f32 %v2298_v50 }
 0x42d   :  { %v2300_v10 = vmul.f32 1.442695, %v2297_v53 }
 0x42f   :  { %3085 = vpow2.f32 %v2300_v10 }
 0x435   :  { %v3084_v58 = vpop.eup %3083 }
 0x436   :  { %2302 = vadd.xlane.f32.xlu1 %v3084_v58 }
 0x439   :  { %v3086_v59 = vpop.eup %3085 }
 0x43a   :  { %2304 = vadd.xlane.f32.xlu1 %v3086_v59 }
 0x4c3   :  { %v2303_v60 = vpop.xlane.xlu1 %2302 }
 0x4c4   :  { %3087 = vlog2.f32 %v2303_v60 }
 0x4c7   :  { %v2305_v61 = vpop.xlane.xlu1 %2304 }
 0x4c8   :  { %3089 = vlog2.f32 %v2305_v61 }
 0x4ce   :  { %v3088_v62 = vpop.eup %3087 }
 0x4cf   :  { %v2307_v63 = vmul.f32 0.6931472, %v3088_v62 }
 0x4d1   :  { %v2310_v0 = vsub.f32 %v2296_v49, %v2307_v63 }
 0x4d2   :  { %v3090_v1 = vpop.eup %3089 }
 0x4d3   :  { %2312 = vst [vmem:[%s4057_s7] sm:$0xff] %v2310_v0  ;;  %v2309_v2 = vmul.f32 0.6931472, %v3090_v1 }
 0x4d5   :  { %v2311_v3 = vsub.f32 %v2297_v53, %v2309_v2 }
 0x4d7   :  { %2313 = vst [vmem:[%s4057_s7 + $0x8] sm:$0xff] %v2311_v3 }

</bundles_post_ra>
